<compile_context>
chip_gen: v6e
topology: v6e:2x2x1
jax: 0.10.0
libtpu: 0.0.40
codegen_flags: <defaults>
</compile_context>

<pallas_src>
import functools

import numpy as np

import jax
import jax.numpy as jnp
from jax import lax
from jax.experimental import pallas as pl
from jax.experimental.pallas import tpu as pltpu


def _bsc_s_kernel(x_ref, wf_ref, bf_ref, wdw_ref, bdw_ref, mask_ref, o_ref, *, H, W, Nb):
    """x_ref: (Nb, Cin, H*W) block -> o_ref: (Nb, Cout, H*W), spatial on lanes."""
    HW = H * W
    wf = wf_ref[...]                                 # (Cout, Cin) fused pointwise weight
    bf = bf_ref[...]                                 # (Cout, 1)  fused pointwise bias
    wdw = wdw_ref[...]                               # (Cout, 9)  depthwise taps, k=(ky+1)*3+(kx+1)
    bdw = bdw_ref[...]                               # (Cout, 1)  depthwise bias
    masks = mask_ref[...]                            # (9, HW)    precomputed edge masks (f32)

    taps = [(ky, kx) for ky in (-1, 0, 1) for kx in (-1, 0, 1)]

    for nb in range(Nb):                             # static unroll; Nb is small by construction
        x = x_ref[nb]                                # (Cin, HW)

        # ---- fused pointwise convs (1x1 -> 1x1) as a single MXU matmul ----
        y = jnp.dot(wf, x, preferred_element_type=jnp.float32) + bf   # (Cout, HW)

        # ---- depthwise 3x3, stride 1, padding 1 (shift-and-mask, no padded buffer) ----
        # Center tap + bias folded into the accumulator init.
        acc = y * wdw[:, 4:5] + bdw
        for k, (ky, kx) in enumerate(taps):
            if ky == 0 and kx == 0:
                continue
            s = ky * W + kx                          # want tap[i] = y[i + s]
            tap = pltpu.roll(y, (-s) % HW, axis=1)   # XLU lane rotation
            # (1, HW) mask broadcasts over the Cout sublanes; zeroes wrapped taps.
            acc = acc + (tap * masks[k:k + 1]) * wdw[:, k:k + 1]

        o_ref[nb] = acc.astype(o_ref.dtype)


def _make_tap_masks(H, W):
    """(9, H*W) f32 masks, one per 3x3 tap, zero where the tap falls outside the image."""
    h = np.arange(H).reshape(H, 1)
    w = np.arange(W).reshape(1, W)
    ones = np.ones((H, W), dtype=bool)
    out = []
    for ky in (-1, 0, 1):
        hm = ones if ky == 0 else ((h >= 1) if ky == -1 else (h < H - 1))
        for kx in (-1, 0, 1):
            wm = ones if kx == 0 else ((w >= 1) if kx == -1 else (w < W - 1))
            out.append((hm & wm).astype(np.float32).reshape(H * W))
    return jnp.asarray(np.stack(out, axis=0))


def _pick_block_batch_and_vmem(N, Cin, Cout, HW):
    """Choose images-per-grid-step and a VMEM limit from the hardware VMEM capacity."""
    try:
        vmem_cap = int(pltpu.get_tpu_info().vmem_capacity_bytes)
    except Exception:
        vmem_cap = 64 * 1024 * 1024                  # conservative: v7x per-TC VMEM
    # Grid-invariant blocks (weights + tap masks), assume double-buffered.
    fixed = 2 * 4 * (9 * HW + Cout * (Cin + 9 + 2))
    # Per-image: double-buffered in/out blocks + ~3 live f32 temps (y, acc, tap).
    per_img = 4 * (2 * (Cin + Cout) * HW + 3 * Cout * HW)
    budget = int(0.6 * vmem_cap) - fixed
    nb = max(1, budget // per_img)
    nb = int(min(nb, max(1, N // 2)))                # keep >= 2 "parallel" steps (v7x: 2 TCs)
    while N % nb:                                    # keep the grid exact
        nb -= 1
    used = fixed + nb * per_img
    vmem_limit = int(min(max(used + (16 << 20), 32 << 20), vmem_cap))
    return nb, vmem_limit


def bsc_s_forward(x_nchw, params):
    """x_nchw: (N, Cin, H, W) float32 -> (N, Cout, H, W) float32."""
    w1, b1, w2, b2, wdw, bdw = params
    N, Cin, H, W = x_nchw.shape
    Cout = w2.shape[1]
    HW = H * W

    # Fold the two pointwise convs (no nonlinearity between them) -- exact algebra.
    wf = jnp.transpose(w1 @ w2)                      # (Cout, Cin)
    bf = jnp.reshape(b1 @ w2 + b2, (Cout, 1))        # (Cout, 1)
    # Depthwise weight as (Cout, 9), column index = (ky+1)*3 + (kx+1).
    wdw_k = jnp.transpose(jnp.reshape(wdw, (9, Cout)))
    bdw_k = jnp.reshape(bdw, (Cout, 1))
    tap_masks = _make_tap_masks(H, W)                # (9, HW), grid-invariant

    # Free row-major reshape: channels stay on sublanes, spatial flattens onto lanes.
    x_flat = jnp.reshape(x_nchw, (N, Cin, HW))

    Nb, vmem_limit = _pick_block_batch_and_vmem(N, Cin, Cout, HW)

    kernel = functools.partial(_bsc_s_kernel, H=H, W=W, Nb=Nb)
    out_flat = pl.pallas_call(
        kernel,
        out_shape=jax.ShapeDtypeStruct((N, Cout, HW), jnp.float32),
        grid_spec=pltpu.PrefetchScalarGridSpec(
            num_scalar_prefetch=0,
            grid=(N // Nb,),
            in_specs=[
                pl.BlockSpec((Nb, Cin, HW), lambda n: (n, 0, 0)),
                pl.BlockSpec((Cout, Cin), lambda n: (0, 0)),
                pl.BlockSpec((Cout, 1), lambda n: (0, 0)),
                pl.BlockSpec((Cout, 9), lambda n: (0, 0)),
                pl.BlockSpec((Cout, 1), lambda n: (0, 0)),
                pl.BlockSpec((9, HW), lambda n: (0, 0)),
            ],
            out_specs=pl.BlockSpec((Nb, Cout, HW), lambda n: (n, 0, 0)),
        ),
        compiler_params=pltpu.CompilerParams(
            dimension_semantics=("parallel",),
            vmem_limit_bytes=vmem_limit,
        ),
    )(x_flat, wf, bf, wdw_k, bdw_k, tap_masks)

    return jnp.reshape(out_flat, (N, Cout, H, W))    # free reshape back to NCHW


def make_params(key, c_in, c_out):
    """Deterministic parameter init (shapes match the PyTorch module)."""
    k1, k2, k3, k4, k5, k6 = jax.random.split(key, 6)
    # pointwise conv 1: torch weight (Cin, Cin, 1, 1) -> stored as (Cin_in, Cin_out)
    w1 = jax.random.normal(k1, (c_in, c_in), jnp.float32) * 0.2
    b1 = jax.random.normal(k2, (1, c_in), jnp.float32) * 0.1
    # pointwise conv 2: torch weight (Cout, Cin, 1, 1) -> stored as (Cin, Cout)
    w2 = jax.random.normal(k3, (c_in, c_out), jnp.float32) * 0.2
    b2 = jax.random.normal(k4, (1, c_out), jnp.float32) * 0.1
    # depthwise conv: torch weight (Cout, 1, 3, 3) -> stored as (3, 3, Cout)
    wdw = jax.random.normal(k5, (3, 3, c_out), jnp.float32) * 0.2
    bdw = jax.random.normal(k6, (1, c_out), jnp.float32) * 0.1
    return (w1, b1, w2, b2, wdw, bdw)


def reference_forward(x_nchw, params):
    """Pure-JAX (XLA) reference matching the PyTorch semantics."""
    w1, b1, w2, b2, wdw, bdw = params
    c_out = w2.shape[1]
    h1 = jnp.einsum('nchw,co->nohw', x_nchw, w1) + b1[0][None, :, None, None]
    h2 = jnp.einsum('nchw,co->nohw', h1, w2) + b2[0][None, :, None, None]
    w_dw = jnp.transpose(wdw, (2, 0, 1))[:, None, :, :]   # (Cout, 1, 3, 3)
    out = lax.conv_general_dilated(
        h2, w_dw, window_strides=(1, 1), padding=((1, 1), (1, 1)),
        dimension_numbers=('NCHW', 'OIHW', 'NCHW'),
        feature_group_count=c_out)
    return out + bdw[0][None, :, None, None]


if __name__ == "__main__":
    N, C_IN, C_OUT, H, W = 2, 4, 8, 16, 16

    key = jax.random.PRNGKey(0)
    kx, kp = jax.random.split(key)
    x = jax.random.normal(kx, (N, C_IN, H, W), jnp.float32)
    params = make_params(kp, C_IN, C_OUT)

    out = bsc_s_forward(x, params)
    out = jax.block_until_ready(out)

    ref = reference_forward(x, params)
    assert out.shape == (N, C_OUT, H, W)
    assert jnp.allclose(out, ref, atol=1e-4, rtol=1e-4), "mismatch vs XLA reference"

    print("KERNEL_OK")
</pallas_src>

<mosaic_0001>
module attributes {stable_mosaic.version = 11 : i64} {
  func.func @_bsc_s_kernel(%arg0: i32, %arg1: memref<1x4x256xf32, #tpu.memory_space<vmem>>, %arg2: memref<8x4xf32, #tpu.memory_space<vmem>>, %arg3: memref<8x1xf32, #tpu.memory_space<vmem>>, %arg4: memref<8x9xf32, #tpu.memory_space<vmem>>, %arg5: memref<8x1xf32, #tpu.memory_space<vmem>>, %arg6: memref<9x256xf32, #tpu.memory_space<vmem>>, %arg7: memref<1x8x256xf32, #tpu.memory_space<vmem>>) attributes {dimension_semantics = [#tpu.dimension_semantics<parallel>], iteration_bounds = array<i64: 2>, scalar_prefetch = 0 : i64, scratch_operands = 0 : i64, tpu.core_type = #tpu.core_type<tc>, window_params = [{transform_indices = @transform_0, window_bounds = array<i64: 1, 4, 256>}, {pipeline_mode = #tpu.pipeline_mode<synchronous>, transform_indices = @transform_1, window_bounds = array<i64: 8, 4>}, {pipeline_mode = #tpu.pipeline_mode<synchronous>, transform_indices = @transform_2, window_bounds = array<i64: 8, 1>}, {pipeline_mode = #tpu.pipeline_mode<synchronous>, transform_indices = @transform_3, window_bounds = array<i64: 8, 9>}, {pipeline_mode = #tpu.pipeline_mode<synchronous>, transform_indices = @transform_4, window_bounds = array<i64: 8, 1>}, {pipeline_mode = #tpu.pipeline_mode<synchronous>, transform_indices = @transform_5, window_bounds = array<i64: 9, 256>}, {transform_indices = @transform_6, window_bounds = array<i64: 1, 8, 256>}]} {
    %c0 = arith.constant 0 : index
    %c0_0 = arith.constant 0 : index
    %0 = vector.load %arg2[%c0, %c0_0] : memref<8x4xf32, #tpu.memory_space<vmem>>, vector<8x4xf32>
    %c0_1 = arith.constant 0 : index
    %c0_2 = arith.constant 0 : index
    %1 = vector.load %arg3[%c0_1, %c0_2] : memref<8x1xf32, #tpu.memory_space<vmem>>, vector<8x1xf32>
    %c0_3 = arith.constant 0 : index
    %c0_4 = arith.constant 0 : index
    %2 = vector.load %arg4[%c0_3, %c0_4] : memref<8x9xf32, #tpu.memory_space<vmem>>, vector<8x9xf32>
    %c0_5 = arith.constant 0 : index
    %c0_6 = arith.constant 0 : index
    %3 = vector.load %arg5[%c0_5, %c0_6] : memref<8x1xf32, #tpu.memory_space<vmem>>, vector<8x1xf32>
    %c0_7 = arith.constant 0 : index
    %c0_8 = arith.constant 0 : index
    %4 = vector.load %arg6[%c0_7, %c0_8] : memref<9x256xf32, #tpu.memory_space<vmem>>, vector<9x256xf32>
    %c0_9 = arith.constant 0 : index
    %c0_10 = arith.constant 0 : index
    %c0_11 = arith.constant 0 : index
    %5 = vector.load %arg1[%c0_9, %c0_10, %c0_11] : memref<1x4x256xf32, #tpu.memory_space<vmem>>, vector<1x4x256xf32>
    %6 = vector.shape_cast %5 : vector<1x4x256xf32> to vector<4x256xf32>
    %cst = arith.constant dense<0.000000e+00> : vector<8x256xf32>
    %7 = tpu.matmul %0, %6, %cst {dimension_numbers = #tpu.dot_dimension_numbers<[1], [0], [0], [1], [0, 0, 1, 1], [], []>} : vector<8x4xf32>, vector<4x256xf32>, vector<8x256xf32> -> vector<8x256xf32>
    %8 = vector.broadcast %1 : vector<8x1xf32> to vector<8x256xf32>
    %9 = arith.addf %7, %8 : vector<8x256xf32>
    %10 = vector.extract_strided_slice %2 {offsets = [0, 4], sizes = [8, 1], strides = [1, 1]} : vector<8x9xf32> to vector<8x1xf32>
    %11 = vector.broadcast %10 : vector<8x1xf32> to vector<8x256xf32>
    %12 = arith.mulf %9, %11 : vector<8x256xf32>
    %13 = vector.broadcast %3 : vector<8x1xf32> to vector<8x256xf32>
    %14 = arith.addf %12, %13 : vector<8x256xf32>
    %c17_i32 = arith.constant 17 : i32
    %15 = tpu.dynamic_rotate %9 by %c17_i32 dim 1 : vector<8x256xf32>, i32 -> vector<8x256xf32>
    %16 = vector.extract_strided_slice %4 {offsets = [0, 0], sizes = [1, 256], strides = [1, 1]} : vector<9x256xf32> to vector<1x256xf32>
    %17 = vector.broadcast %16 : vector<1x256xf32> to vector<8x256xf32>
    %18 = arith.mulf %15, %17 : vector<8x256xf32>
    %19 = vector.extract_strided_slice %2 {offsets = [0, 0], sizes = [8, 1], strides = [1, 1]} : vector<8x9xf32> to vector<8x1xf32>
    %20 = vector.broadcast %19 : vector<8x1xf32> to vector<8x256xf32>
    %21 = arith.mulf %18, %20 : vector<8x256xf32>
    %22 = arith.addf %14, %21 : vector<8x256xf32>
    %c16_i32 = arith.constant 16 : i32
    %23 = tpu.dynamic_rotate %9 by %c16_i32 dim 1 : vector<8x256xf32>, i32 -> vector<8x256xf32>
    %24 = vector.extract_strided_slice %4 {offsets = [1, 0], sizes = [1, 256], strides = [1, 1]} : vector<9x256xf32> to vector<1x256xf32>
    %25 = vector.broadcast %24 : vector<1x256xf32> to vector<8x256xf32>
    %26 = arith.mulf %23, %25 : vector<8x256xf32>
    %27 = vector.extract_strided_slice %2 {offsets = [0, 1], sizes = [8, 1], strides = [1, 1]} : vector<8x9xf32> to vector<8x1xf32>
    %28 = vector.broadcast %27 : vector<8x1xf32> to vector<8x256xf32>
    %29 = arith.mulf %26, %28 : vector<8x256xf32>
    %30 = arith.addf %22, %29 : vector<8x256xf32>
    %c15_i32 = arith.constant 15 : i32
    %31 = tpu.dynamic_rotate %9 by %c15_i32 dim 1 : vector<8x256xf32>, i32 -> vector<8x256xf32>
    %32 = vector.extract_strided_slice %4 {offsets = [2, 0], sizes = [1, 256], strides = [1, 1]} : vector<9x256xf32> to vector<1x256xf32>
    %33 = vector.broadcast %32 : vector<1x256xf32> to vector<8x256xf32>
    %34 = arith.mulf %31, %33 : vector<8x256xf32>
    %35 = vector.extract_strided_slice %2 {offsets = [0, 2], sizes = [8, 1], strides = [1, 1]} : vector<8x9xf32> to vector<8x1xf32>
    %36 = vector.broadcast %35 : vector<8x1xf32> to vector<8x256xf32>
    %37 = arith.mulf %34, %36 : vector<8x256xf32>
    %38 = arith.addf %30, %37 : vector<8x256xf32>
    %c1_i32 = arith.constant 1 : i32
    %39 = tpu.dynamic_rotate %9 by %c1_i32 dim 1 : vector<8x256xf32>, i32 -> vector<8x256xf32>
    %40 = vector.extract_strided_slice %4 {offsets = [3, 0], sizes = [1, 256], strides = [1, 1]} : vector<9x256xf32> to vector<1x256xf32>
    %41 = vector.broadcast %40 : vector<1x256xf32> to vector<8x256xf32>
    %42 = arith.mulf %39, %41 : vector<8x256xf32>
    %43 = vector.extract_strided_slice %2 {offsets = [0, 3], sizes = [8, 1], strides = [1, 1]} : vector<8x9xf32> to vector<8x1xf32>
    %44 = vector.broadcast %43 : vector<8x1xf32> to vector<8x256xf32>
    %45 = arith.mulf %42, %44 : vector<8x256xf32>
    %46 = arith.addf %38, %45 : vector<8x256xf32>
    %c255_i32 = arith.constant 255 : i32
    %47 = tpu.dynamic_rotate %9 by %c255_i32 dim 1 : vector<8x256xf32>, i32 -> vector<8x256xf32>
    %48 = vector.extract_strided_slice %4 {offsets = [5, 0], sizes = [1, 256], strides = [1, 1]} : vector<9x256xf32> to vector<1x256xf32>
    %49 = vector.broadcast %48 : vector<1x256xf32> to vector<8x256xf32>
    %50 = arith.mulf %47, %49 : vector<8x256xf32>
    %51 = vector.extract_strided_slice %2 {offsets = [0, 5], sizes = [8, 1], strides = [1, 1]} : vector<8x9xf32> to vector<8x1xf32>
    %52 = vector.broadcast %51 : vector<8x1xf32> to vector<8x256xf32>
    %53 = arith.mulf %50, %52 : vector<8x256xf32>
    %54 = arith.addf %46, %53 : vector<8x256xf32>
    %c241_i32 = arith.constant 241 : i32
    %55 = tpu.dynamic_rotate %9 by %c241_i32 dim 1 : vector<8x256xf32>, i32 -> vector<8x256xf32>
    %56 = vector.extract_strided_slice %4 {offsets = [6, 0], sizes = [1, 256], strides = [1, 1]} : vector<9x256xf32> to vector<1x256xf32>
    %57 = vector.broadcast %56 : vector<1x256xf32> to vector<8x256xf32>
    %58 = arith.mulf %55, %57 : vector<8x256xf32>
    %59 = vector.extract_strided_slice %2 {offsets = [0, 6], sizes = [8, 1], strides = [1, 1]} : vector<8x9xf32> to vector<8x1xf32>
    %60 = vector.broadcast %59 : vector<8x1xf32> to vector<8x256xf32>
    %61 = arith.mulf %58, %60 : vector<8x256xf32>
    %62 = arith.addf %54, %61 : vector<8x256xf32>
    %c240_i32 = arith.constant 240 : i32
    %63 = tpu.dynamic_rotate %9 by %c240_i32 dim 1 : vector<8x256xf32>, i32 -> vector<8x256xf32>
    %64 = vector.extract_strided_slice %4 {offsets = [7, 0], sizes = [1, 256], strides = [1, 1]} : vector<9x256xf32> to vector<1x256xf32>
    %65 = vector.broadcast %64 : vector<1x256xf32> to vector<8x256xf32>
    %66 = arith.mulf %63, %65 : vector<8x256xf32>
    %67 = vector.extract_strided_slice %2 {offsets = [0, 7], sizes = [8, 1], strides = [1, 1]} : vector<8x9xf32> to vector<8x1xf32>
    %68 = vector.broadcast %67 : vector<8x1xf32> to vector<8x256xf32>
    %69 = arith.mulf %66, %68 : vector<8x256xf32>
    %70 = arith.addf %62, %69 : vector<8x256xf32>
    %c239_i32 = arith.constant 239 : i32
    %71 = tpu.dynamic_rotate %9 by %c239_i32 dim 1 : vector<8x256xf32>, i32 -> vector<8x256xf32>
    %72 = vector.extract_strided_slice %4 {offsets = [8, 0], sizes = [1, 256], strides = [1, 1]} : vector<9x256xf32> to vector<1x256xf32>
    %73 = vector.broadcast %72 : vector<1x256xf32> to vector<8x256xf32>
    %74 = arith.mulf %71, %73 : vector<8x256xf32>
    %75 = vector.extract_strided_slice %2 {offsets = [0, 8], sizes = [8, 1], strides = [1, 1]} : vector<8x9xf32> to vector<8x1xf32>
    %76 = vector.broadcast %75 : vector<8x1xf32> to vector<8x256xf32>
    %77 = arith.mulf %74, %76 : vector<8x256xf32>
    %78 = arith.addf %70, %77 : vector<8x256xf32>
    %c0_12 = arith.constant 0 : index
    %c0_13 = arith.constant 0 : index
    %c0_14 = arith.constant 0 : index
    %79 = vector.load %arg7[%c0_12, %c0_13, %c0_14] : memref<1x8x256xf32, #tpu.memory_space<vmem>>, vector<1x8x256xf32>
    %80 = vector.shape_cast %79 : vector<1x8x256xf32> to vector<8x256xf32>
    %81 = vector.shape_cast %78 : vector<8x256xf32> to vector<1x8x256xf32>
    tpu.vector_store %arg7[%c0_12, %c0_13, %c0_14], %81 {strides = array<i32>} : memref<1x8x256xf32, #tpu.memory_space<vmem>>, vector<1x8x256xf32>,
    return
  }
  func.func @transform_0(%arg0: i32) -> (i32, i32, i32) {
    %c0_i32 = arith.constant 0 : i32
    %c0_i32_0 = arith.constant 0 : i32
    %c0_i32_1 = arith.constant 0 : i32
    return %arg0, %c0_i32, %c0_i32_0 : i32, i32, i32
  }
  func.func @transform_1(%arg0: i32) -> (i32, i32) {
    %c0_i32 = arith.constant 0 : i32
    %c0_i32_0 = arith.constant 0 : i32
    %c0_i32_1 = arith.constant 0 : i32
    return %c0_i32, %c0_i32_0 : i32, i32
  }
  func.func @transform_2(%arg0: i32) -> (i32, i32) {
    %c0_i32 = arith.constant 0 : i32
    %c0_i32_0 = arith.constant 0 : i32
    %c0_i32_1 = arith.constant 0 : i32
    return %c0_i32, %c0_i32_0 : i32, i32
  }
  func.func @transform_3(%arg0: i32) -> (i32, i32) {
    %c0_i32 = arith.constant 0 : i32
    %c0_i32_0 = arith.constant 0 : i32
    %c0_i32_1 = arith.constant 0 : i32
    return %c0_i32, %c0_i32_0 : i32, i32
  }
  func.func @transform_4(%arg0: i32) -> (i32, i32) {
    %c0_i32 = arith.constant 0 : i32
    %c0_i32_0 = arith.constant 0 : i32
    %c0_i32_1 = arith.constant 0 : i32
    return %c0_i32, %c0_i32_0 : i32, i32
  }
  func.func @transform_5(%arg0: i32) -> (i32, i32) {
    %c0_i32 = arith.constant 0 : i32
    %c0_i32_0 = arith.constant 0 : i32
    %c0_i32_1 = arith.constant 0 : i32
    return %c0_i32, %c0_i32_0 : i32, i32
  }
  func.func @transform_6(%arg0: i32) -> (i32, i32, i32) {
    %c0_i32 = arith.constant 0 : i32
    %c0_i32_0 = arith.constant 0 : i32
    %c0_i32_1 = arith.constant 0 : i32
    return %arg0, %c0_i32, %c0_i32_0 : i32, i32, i32
  }
}

</mosaic_0001>

<bundles_post_ra>
// kernel: tpu_custom_call.1
= control target key start
LH: loop header
LB: loop body
LE: loop exit
PB: predicated region body
PF: predicated region fallthrough
CT: control target
= control target key end

     0   :  { %s1262_s0 = inlined_call_operand.hbm [shape: f32[2,4,256], index: 0, kind: input, shape index: {}]   ;;  %s1263_s1 = inlined_call_operand.vmem [shape: f32[8,4], index: 1, kind: input, shape index: {}]   ;;  %s1264_s2 = inlined_call_operand.vmem [shape: f32[8,1], index: 2, kind: input, shape index: {}]   ;;  %s1265_s3 = inlined_call_operand.hbm [shape: f32[8,9], index: 3, kind: input, shape index: {}]   ;;  %s1266_s4 = inlined_call_operand.vmem [shape: f32[8,1], index: 4, kind: input, shape index: {}]   ;;  %s1267_s5 = inlined_call_operand.vmem [shape: f32[9,256], index: 5, kind: input, shape index: {}]   ;;  %s1268_s6 = inlined_call_operand.hbm [shape: f32[2,8,256], index: 6, kind: output, shape index: {}]  }
   0x1   :  { %1273 = sst [smem:[#allocation11_spill]] %s1265_s3 }
   0x2   :  { %11 = vsyncpa [#allocation3], 0 }
   0x3   :  { %13 = vsyncpa [#allocation3 + $0x1], 0 }
   0x4   :  { %14 = vsyncpa [#allocation6], 0 }
   0x5   :  { %15 = vsyncpa [#allocation4], 0 }
   0x6   :  { %17 = vsyncpa [#allocation4 + $0x1], 0  ;;  %s979_s21 = smov 0   ;;  %s981_s22 = smov 0  }
   0x7   :  { %s983_s23 = smov 0   ;;  %s985_s24 = smov 0  }
   0x8 LB: > { %s1000_s25 = sadd.s32 4294967295, %s921_s24   ;;  %s690_s26 = sadd.s32 4294967294, %s921_s24   ;;  %s921_s24 = sphi %s985_s24, %s1293_s24   ;;  %s917_s23 = sphi %s983_s23, %s1292_s23   ;;  %s913_s22 = sphi %s981_s22, %s1291_s22   ;;  %s909_s21 = sphi %s979_s21, %s1290_s21  }
   0x9   : > { %p43_p0 = scmp.ne.s32.totalorder %s913_s22, %s909_s21  ;;  %p1269_p1 = scmp.eq.s32.totalorder %s1000_s25, 0 }
   0xa   : > { %p178_p3 = scmp.eq.s32.totalorder %s690_s26, 1  ;;  %p691_p5 = scmp.ge.s32.totalorder %s921_s24, 1 }
   0xb   : > { %p1009_p4 = por %p1269_p1, %p43_p0  ;;  %p185_p7 = scmp.lt.s32.totalorder %s921_s24, 3 }
   0xc   : > { %p1014_p6 = por %p178_p3, %p43_p0  ;;  %s923_s30 = smov [#allocation5]  }
   0xd   : > { %s1274_s27 = scalar_select %p1009_p4, 1, 0 }
   0xe   : > { %s1275_s28 = scalar_select %p1014_p6, 1, 0 }
   0xf   : > { %p1019_p8 = pnand %p691_p5, %p185_p7  ;;  %s204_s7 = sshll.u32 %s923_s30, 4  ;;  %s205_s7 = int_to_ptr.vmem [resolvable:$true] %s204_s7 }
  0x10   : > { %s1027_s8 = sadd.s32 1, %s921_s24   ;;  %s30_s12 = sadd.s32 1, %s917_s23 }
  0x11   : > { %s1276_s29 = scalar_select %p1019_p8, 1, 0 }
  0x12   : > { %p721_p10 = pneg %p1019_p8  ;;  %s27_s10 = ssub.s32 %s921_s24, %s1027_s8 }
  0x13   : > { %p1037_p12 = scmp.eq.s32.totalorder %s27_s10, 0  ;;  %p37_p13 = scmp.ne.s32.totalorder %s917_s23, %s913_s22 }
  0x14   : > { %p1031_p11 = pnand %p721_p10, %p1269_p1  ;;  %s810_s13 = scalar_lea.vmem %s205_s7, 128 }
  0x15   : > { %p811_p3 = scmp.ne.s32.totalorder %s205_s7, %s810_s13  ;;  %p818_p9 = scmp.lt.s32.totalorder %s205_s7, %s205_s7 }
  0x16   : > { %p801_p0 = pneg %p1031_p11  ;;  %p819_p2 = scmp.lt.s32.totalorder %s810_s13, %s810_s13 }
  0x18   : > { %p813_p5 = pnand %p811_p3, %p801_p0  ;;  %p820_p10 = por %p819_p2, %p818_p9 }
  0x1a   : > { %p814_p7 = pneg %p813_p5 }
  0x1c   : > { %p821_p1 = pnand %p820_p10, %p814_p7 }
  0x1e   : > { %824 = shalt.err (!%p821_p1)
}
  0x1f   : > { %s1279_s3 = sld [smem:[#allocation11_spill]]  ;;  %p38_p1 = scmp.eq.s32.totalorder %s921_s24, 0 }
  0x20   : > { %s1054_s16 = scalar_select %p1037_p12, %s917_s23, %s30_s12  }
  0x21   : > { %p1280_p2 = scmp.eq.s32.totalorder %s1000_s25, 1  ;;  %p734_p0 = scmp.lt.s32.totalorder %s921_s24, 2 }
  0x22   : > { %s221_s18 = sand.u32 1, %s917_s23   ;;  %p39_p3 = por %p38_p1, %p37_p13 }
  0x23   : > { %p1062_p9 = por %p1280_p2, %p37_p13  ;;  %s694_s19 = sshll.u32 %s221_s18, 3 }
  0x24   : > { %s711_s20 = sshll.u32 %s921_s24, 7  ;;  %s225_s9 = scalar_lea.vmem [#allocation2], %s694_s19 }
  0x25   : > { %724 = dma.hbm_to_vmem [thread:$0]  (!%p1031_p11), %s1279_s3, 128, %s205_s7, [#allocation6]  }
  0x26   : > { %s1281_s17 = scalar_select %p1062_p9, 1, 0 }
  0x27   : > { %s1075_s7 = scalar_lea.hbm %s1262_s0, %s711_s20  ;;  %s233_s10 = sshll.u32 %s225_s9, 4  ;;  %s234_s10 = int_to_ptr.vmem [resolvable:$true] %s233_s10 }
  0x28   : > { %p1077_p11 = pnand %p734_p0, %p39_p3  ;;  %s222_s12 = scalar_lea.sflag [#allocation3], %s221_s18 }
  0x29   : > { %s825_s13 = scalar_lea.hbm %s1075_s7, 128  ;;  %s830_s20 = scalar_lea.hbm %s1262_s0, 256 }
  0x2a   : > { %p826_p12 = scmp.ne.s32.totalorder %s1075_s7, %s825_s13  ;;  %p827_p13 = pneg %p1077_p11 }
  0x2b   : > { %p831_p10 = scmp.lt.s32.totalorder %s1075_s7, %s1262_s0  ;;  %p832_p1 = scmp.lt.s32.totalorder %s830_s20, %s825_s13 }
  0x2c   : > { %p828_p5 = pnand %p827_p13, %p826_p12 }
  0x2d   : > { %p833_p2 = por %p832_p1, %p831_p10 }
  0x2e   : > { %p829_p7 = pneg %p828_p5 }
  0x30   : > { %p834_p0 = pnand %p833_p2, %p829_p7 }
  0x32   : > { %837 = shalt.err (!%p834_p0)
}
  0x33   : > { %s838_s30 = scalar_lea.vmem %s234_s10, 128  ;;  %s924_s18 = smov [#allocation2]  }
  0x34   : > { %p839_p3 = scmp.ne.s32.totalorder %s234_s10, %s838_s30  ;;  %s843_s9 = sshll.u32 %s924_s18, 4  ;;  %s844_s9 = int_to_ptr.vmem [resolvable:$false] %s843_s9 }
  0x35   : > { %s845_s3 = scalar_lea.vmem %s844_s9, 256  ;;  %p846_p12 = scmp.lt.s32.totalorder %s234_s10, %s844_s9 }
  0x36   : > { %p841_p6 = pnand %p839_p3, %p827_p13  ;;  %p847_p5 = scmp.lt.s32.totalorder %s845_s3, %s838_s30 }
  0x38   : > { %p842_p9 = pneg %p841_p6  ;;  %p848_p4 = por %p847_p5, %p846_p12 }
  0x3a   : > { %p849_p8 = pnand %p848_p4, %p842_p9 }
  0x3c   : > { %852 = shalt.err (!%p849_p8)
}
  0x3d   : > { %728 = dma.hbm_to_vmem [thread:$0]  (!%p1077_p11), %s1075_s7, 128, %s234_s10, %s222_s12  }
  0x3e   : > { %p1283_p7 = scmp.ne.s32.totalorder %s1276_s29, 0 }
  0x3f   : > { %s1098_s13 = sand.u32 (!%p1283_p7), 1, %s913_s22   ;;  %p1284_p6 = scmp.ne.s32.totalorder (!%p1283_p7), %s1274_s27, 0 }
  0x40   : > { %242 = sbr.rel (%p1283_p7) target bundleno = 460 (0x1cc), region = 44  ;;  %s698_s14 = sshll.u32 (!%p1283_p7), %s1098_s13, 3 }
  0x41   : > { %s245_s15 = scalar_lea.sflag (!%p1283_p7), [#allocation3], %s1098_s13  ;;  %s248_s20 = scalar_lea.vmem (!%p1283_p7), [#allocation2], %s698_s14 }
  0x45   : > { %896 = dma.done.wait (%p1284_p6), %s245_s15, 128  }
  0x46   : > { %898 = vsyncadd (%p1284_p6), %s245_s15, 4294967168  ;;  %p1285_p4 = scmp.eq.s32.totalorder %s1000_s25, 0 }
  0x48   : > { %900 = dma.done.wait (%p1285_p4), [#allocation6], 128   ;;  %p1286_p8 = pmov %p1285_p4 }
  0x49   : > { %v925_v0 = vmov 0.0   ;;  %v926_v1 = vmov 0   ;;  %v289_v2 = vld [vmem:[%s248_s20] sm:$0xff]  ;;  %vm301_vm0 = vcmask 1043456   ;;  %vm297_vm1 = vcmask 31744   ;;  %v283_v7 = vld [vmem:[#allocation5] sm:$0xff] }
  0x4a   : > { %902 = vsyncadd (%p1286_p8), [#allocation6], 4294967168  ;;  %370 = vmatprep.mubr.f32.mxu0 %v925_v0  ;;  %788 = vset.pattern.permute.xlu0 %v926_v1  ;;  %v282_v3 = vld [vmem:[%s1264_s2] sm:$0xff]  ;;  %v296_v4 = vcombine.high %v289_v2, %v289_v2  ;;  %v927_v8 = vmov 4   ;;  %v928_v9 = vmov 2   ;;  %v929_v10 = vmov 1  }
  0x4b   : > { %790 = vset.pattern.permute.xlu1 %v926_v1  ;;  %292 = vperm.xlu0 %788, %v282_v3   ;;  %v284_v5 = vld [vmem:[%s1266_s4] sm:$0xff]  ;;  %v930_v11 = vmov 3   ;;  %v931_v12 = vmov 5   ;;  %v932_v13 = vmov 6   ;;  %v933_v14 = vmov 7   ;;  %s934_s12 = smov 16  }
  0x4c   : > { %v281_v6 = vld [vmem:[%s1263_s1] sm:$0xff]  ;;  %386 = vperm.xlu1 %790, %v284_v5   ;;  %701 = vmatprep.subr.msk.mxu0 %vm301_vm0, %v296_v4  ;;  %s935_s26 = smov 17   ;;  %s936_s19 = smov 15   ;;  %v939_v20 = vmov 8   ;;  %v395_v34 = vlaneseq  ;;  %v1150_v42 = vld [vmem:[%s1267_s5 + $0x8] sm:$0xff] }
  0x4d   : > { %702 = vmatpush1.msk.msra.mxu0 %vm301_vm0, %v289_v2  ;;  %s937_s30 = smov 1   ;;  %s938_s18 = smov 127   ;;  %v1145_v41 = vld [vmem:[%s1267_s5] sm:$0xff] }
  0x4e   : > { %703 = vmatmul.mubr.msk.f32.vlgmr.msra.gmra.mxu0 %vm297_vm1, %v281_v6  ;;  %s940_s9 = smov 113   ;;  %s941_s14 = smov 112   ;;  %v1135_v36 = vshrl.u32 %v395_v34, 7  ;;  %v1137_v38 = vand.u32 127, %v395_v34 }
  0x4f   : > { %789 = vset.pattern.permute.xlu0 %v927_v8  ;;  %s942_s15 = smov 111   ;;  %s700_s7 = sshll.u32 %s1098_s13, 4 }
  0x50   : > { %379 = vperm.xlu0 %789, %v283_v7   ;;  %411 = vperm.xlu1 %790, %v283_v7   ;;  %v402_v40 = vsub.s32 0, %v1135_v36  ;;  %vm397_vm2 = vcmp.lt.s32.totalorder %v1137_v38, 17  ;;  %v427_v44 = vsub.s32 1, %v1135_v36  ;;  %vm422_vm3 = vcmp.lt.s32.totalorder %v1137_v38, 16  ;;  %s596_s20 = scalar_lea.sflag [#allocation4], %s1098_s13  ;;  %p1287_p11 = scmp.ne.s32.totalorder %s1281_s17, 0 }
  0x51   : > { %v452_v49 = vsub.s32 2, %v1135_v36  ;;  %vm447_vm4 = vcmp.lt.s32.totalorder %v1137_v38, 15  ;;  %v477_v58 = vsub.s32 3, %v1135_v36  ;;  %vm472_vm5 = vcmp.lt.s32.totalorder %v1137_v38, 1 }
  0x52   : > { %v403_v46 = vrot.slane %v1145_v41, %v402_v40  ;;  %v407_v48 = vrot.slane %v1150_v42, %v402_v40  ;;  %v428_v53 = vrot.slane %v1145_v41, %v427_v44  ;;  %v432_v54 = vrot.slane %v1150_v42, %v427_v44 }
  0x53   : > { %v453_v62 = vrot.slane %v1145_v41, %v452_v49  ;;  %v457_v63 = vrot.slane %v1150_v42, %v452_v49  ;;  %v502_v0 = vsub.s32 5, %v1135_v36  ;;  %v527_v1 = vsub.s32 6, %v1135_v36 }
  0x54   : > { %792 = vset.pattern.permute.xlu0 %v928_v9  ;;  %791 = vset.pattern.permute.xlu1 %v929_v10  ;;  %v478_v8 = vrot.slane %v1145_v41, %v477_v58  ;;  %v482_v9 = vrot.slane %v1150_v42, %v477_v58  ;;  %vm497_vm6 = vcmp.lt.s32.totalorder %v1137_v38, 127  ;;  %vm522_vm7 = vcmp.lt.s32.totalorder %v1137_v38, 113 }
  0x55   : > { %461 = vperm.xlu0 %792, %v283_v7   ;;  %436 = vperm.xlu1 %791, %v283_v7   ;;  %vm547_vm8 = vcmp.lt.s32.totalorder %v1137_v38, 112  ;;  %vm572_vm9 = vcmp.lt.s32.totalorder %v1137_v38, 111 }
  0x59   : > { %793 = vset.pattern.permute.xlu0 %v930_v11 }
  0x5a   : > { %486 = vperm.xlu0 %793, %v283_v7  }
  0x5e   : > { %794 = vset.pattern.permute.xlu0 %v931_v12 }
  0x5f   : > { %511 = vperm.xlu0 %794, %v283_v7  }
  0x63   : > { %795 = vset.pattern.permute.xlu0 %v932_v13 }
  0x64   : > { %536 = vperm.xlu0 %795, %v283_v7  }
  0x68   : > { %796 = vset.pattern.permute.xlu0 %v933_v14 }
  0xc6   : > { %v293_v15 = vpop.permute.xlu0 %292 }
  0xc7   : > { %v387_v21 = vpop.permute.xlu1 %386 }
  0xcb   : > { %v412_v22 = vpop.permute.xlu1 %411  ;;  %v380_v23 = vpop.permute.xlu0 %379 }
  0xd0   : > { %v1119_v24 = vpop.permute.xlu1 %436  ;;  %v1121_v25 = vpop.permute.xlu0 %461 }
  0xd5   : > { %v1123_v27 = vpop.permute.xlu0 %486 }
  0xda   : > { %v1125_v30 = vpop.permute.xlu0 %511 }
  0xdf   : > { %v1129_v32 = vpop.permute.xlu0 %536 }
 0x10e   : > { %v372_v16 = vpop.f32.mrf.mxu0 }
 0x10f   : > { %v373_v17 = vadd.f32 %v372_v16, %v293_v15  ;;  %v503_v16 = vrot.slane %v1145_v41, %v502_v0 }
 0x110   : > { %v374_v18 = vpop.f32.mrf.mxu0 }
 0x111   : > { %418 = vrot.lane.b32.xlu0 %v373_v17, %s934_s12  ;;  %391 = vrot.lane.b32.xlu1 %v373_v17, %s935_s26  ;;  %v375_v19 = vadd.f32 %v374_v18, %v293_v15  ;;  %v382_v47 = vmul.f32 %v380_v23, %v373_v17 }
 0x113   : > { %v383_v52 = vmul.f32 %v380_v23, %v375_v19  ;;  %v389_v59 = vadd.f32 %v387_v21, %v382_v47 }
 0x115   : > { %393 = vrot.lane.b32.xlu0 %v375_v19, %s935_s26  ;;  %443 = vrot.lane.b32.xlu1 %v373_v17, %s936_s19 }
 0x119   : > { %468 = vrot.lane.b32.xlu1 %v373_v17, %s937_s30  ;;  %561 = vperm.xlu0 %796, %v283_v7  }
 0x11d   : > { %493 = vrot.lane.b32.xlu1 %v373_v17, %s938_s18  ;;  %797 = vset.pattern.permute.xlu0 %v939_v20 }
 0x11e   : > { %586 = vperm.xlu0 %797, %v283_v7   ;;  %v390_v7 = vadd.f32 %v387_v21, %v383_v52  ;;  %v528_v21 = vrot.slane %v1145_v41, %v527_v1 }
 0x121   : > { %518 = vrot.lane.b32.xlu1 %v373_v17, %s940_s9 }
 0x125   : > { %543 = vrot.lane.b32.xlu1 %v373_v17, %s941_s14 }
 0x129   : > { %568 = vrot.lane.b32.xlu1 %v373_v17, %s942_s15  ;;  %v507_v17 = vrot.slane %v1150_v42, %v502_v0  ;;  %v705_v0 = vld [vmem:[%s1267_s5 + $0x18] ss:$0 sm:$0xff] }
 0x12d   : > { %420 = vrot.lane.b32.xlu1 %v375_v19, %s934_s12 }
 0x131   : > { %445 = vrot.lane.b32.xlu1 %v375_v19, %s936_s19  ;;  %s712_s19 = sshll.u32 %s1000_s25, 8  ;;  %s943_s25 = smov [#allocation7]  }
 0x132   : > { %s857_s29 = sshll.u32 %s943_s25, 4  ;;  %s858_s29 = int_to_ptr.vmem [resolvable:$false] %s857_s29 }
 0x133   : > { %s859_s27 = scalar_lea.vmem %s858_s29, 512 }
 0x135   : > { %470 = vrot.lane.b32.xlu1 %v375_v19, %s937_s30  ;;  %s280_s30 = scalar_lea.vmem [#allocation7], %s700_s7 }
 0x139   : > { %495 = vrot.lane.b32.xlu1 %v375_v19, %s938_s18  ;;  %s610_s18 = sshll.u32 %s280_s30, 4  ;;  %s611_s18 = int_to_ptr.vmem [resolvable:$true] %s610_s18 }
 0x13a   : > { %s853_s3 = scalar_lea.vmem %s611_s18, 256  ;;  %p860_p1 = scmp.lt.s32.totalorder %s611_s18, %s858_s29 }
 0x13b   : > { %p854_p9 = scmp.ne.s32.totalorder %s611_s18, %s853_s3  ;;  %p861_p2 = scmp.lt.s32.totalorder %s859_s27, %s853_s3 }
 0x13d   : > { %520 = vrot.lane.b32.xlu1 %v375_v19, %s940_s9  ;;  %p855_p13 = pnand %p854_p9, %p1287_p11  ;;  %p862_p0 = por %p861_p2, %p860_p1 }
 0x13f   : > { %p856_p10 = pneg %p855_p13 }
 0x141   : > { %545 = vrot.lane.b32.xlu1 %v375_v19, %s941_s14  ;;  %p863_p3 = pnand %p862_p0, %p856_p10 }
 0x145   : > { %570 = vrot.lane.b32.xlu1 %v375_v19, %s942_s15  ;;  %s1225_s15 = scalar_lea.hbm %s1268_s6, %s712_s19 }
 0x183   : > { %v392_v26 = vpop.permute.xlu1 %391  ;;  %v419_v37 = vpop.permute.xlu0 %418 }
 0x187   : > { %v444_v28 = vpop.permute.xlu1 %443  ;;  %v394_v43 = vpop.permute.xlu0 %393 }
 0x188   : > { %v398_v50 = vsel %vm397_vm2, %v392_v26, %v394_v43  ;;  %v399_v51 = vsel %vm397_vm2, %v394_v43, %v392_v26 }
 0x189   : > { %v408_v60 = vmul.f32 %v403_v46, %v399_v51  ;;  %v409_v61 = vmul.f32 %v407_v48, %v398_v50 }
 0x18b   : > { %v469_v29 = vpop.permute.xlu1 %468  ;;  %v414_v10 = vmul.f32 %v412_v22, %v408_v60  ;;  %v415_v11 = vmul.f32 %v412_v22, %v409_v61 }
 0x18d   : > { %v417_v34 = vadd.f32 %v415_v11, %v390_v7 }
 0x18f   : > { %v1127_v31 = vpop.permute.xlu1 %493 }
 0x193   : > { %v1131_v33 = vpop.permute.xlu1 %518 }
 0x197   : > { %v1133_v35 = vpop.permute.xlu1 %543 }
 0x19b   : > { %v1139_v39 = vpop.permute.xlu1 %568 }
 0x19f   : > { %v421_v45 = vpop.permute.xlu1 %420 }
 0x1a0   : > { %v423_v56 = vsel %vm422_vm3, %v419_v37, %v421_v45  ;;  %v424_v57 = vsel %vm422_vm3, %v421_v45, %v419_v37  ;;  %v532_v37 = vrot.slane %v1150_v42, %v527_v1 }
 0x1a1   : > { %v433_v2 = vmul.f32 %v428_v53, %v424_v57  ;;  %v434_v3 = vmul.f32 %v432_v54, %v423_v56  ;;  %v562_v56 = vpop.permute.xlu0 %561 }
 0x1a3   : > { %v446_v55 = vpop.permute.xlu1 %445  ;;  %v439_v18 = vmul.f32 %v1119_v24, %v433_v2  ;;  %v440_v19 = vmul.f32 %v1119_v24, %v434_v3  ;;  %v552_v24 = vsub.s32 7, %v1135_v36 }
 0x1a4   : > { %v448_v4 = vsel %vm447_vm4, %v444_v28, %v446_v55  ;;  %v449_v5 = vsel %vm447_vm4, %v446_v55, %v444_v28 }
 0x1a5   : > { %v458_v14 = vmul.f32 %v453_v62, %v449_v5  ;;  %v459_v15 = vmul.f32 %v457_v63, %v448_v4  ;;  %v442_v45 = vadd.f32 %v440_v19, %v417_v34  ;;  %v553_v52 = vrot.slane %v1145_v41, %v552_v24  ;;  %v704_v63 = vld [vmem:[%s1267_s5 + $0x10] ss:$0 sm:$0xff] }
 0x1a6   : > { %v557_v53 = vrot.slane %v1150_v42, %v552_v24 }
 0x1a7   : > { %v471_v6 = vpop.permute.xlu1 %470  ;;  %v464_v40 = vmul.f32 %v1121_v25, %v458_v14  ;;  %v465_v43 = vmul.f32 %v1121_v25, %v459_v15 }
 0x1a8   : > { %v473_v12 = vsel %vm472_vm5, %v469_v29, %v471_v6  ;;  %v474_v13 = vsel %vm472_vm5, %v471_v6, %v469_v29  ;;  %v416_v29 = vadd.f32 %v414_v10, %v389_v59  ;;  %v587_v6 = vpop.permute.xlu0 %586 }
 0x1a9   : > { %v483_v23 = vmul.f32 %v478_v8, %v474_v13  ;;  %v484_v26 = vmul.f32 %v482_v9, %v473_v12  ;;  %v467_v55 = vadd.f32 %v465_v43, %v442_v45 }
 0x1aa   : > { %v441_v44 = vadd.f32 %v439_v18, %v416_v29 }
 0x1ab   : > { %v496_v20 = vpop.permute.xlu1 %495  ;;  %v489_v49 = vmul.f32 %v1123_v27, %v483_v23 }
 0x1ac   : > { %v498_v22 = vsel %vm497_vm6, %v1127_v31, %v496_v20  ;;  %v499_v28 = vsel %vm497_vm6, %v496_v20, %v1127_v31  ;;  %v490_v31 = vmul.f32 %v1123_v27, %v484_v26  ;;  %v466_v54 = vadd.f32 %v464_v40, %v441_v44 }
 0x1ad   : > { %v508_v46 = vmul.f32 %v503_v16, %v498_v22  ;;  %v509_v47 = vmul.f32 %v507_v17, %v499_v28 }
 0x1ae   : > { %v491_v59 = vadd.f32 %v489_v49, %v466_v54  ;;  %v492_v60 = vadd.f32 %v490_v31, %v467_v55 }
 0x1af   : > { %v521_v48 = vpop.permute.xlu1 %520  ;;  %v514_v27 = vmul.f32 %v1125_v30, %v508_v46  ;;  %v515_v57 = vmul.f32 %v1125_v30, %v509_v47 }
 0x1b0   : > { %v523_v50 = vsel %vm522_vm7, %v1131_v33, %v521_v48  ;;  %v524_v36 = vsel %vm522_vm7, %v521_v48, %v1131_v33 }
 0x1b1   : > { %v533_v25 = vmul.f32 %v528_v21, %v523_v50  ;;  %v534_v51 = vmul.f32 %v532_v37, %v524_v36  ;;  %v516_v1 = vadd.f32 %v514_v27, %v491_v59  ;;  %v517_v2 = vadd.f32 %v515_v57, %v492_v60 }
 0x1b3   : > { %v546_v58 = vpop.permute.xlu1 %545  ;;  %v539_v42 = vmul.f32 %v1129_v32, %v533_v25  ;;  %v540_v61 = vmul.f32 %v1129_v32, %v534_v51 }
 0x1b4   : > { %v548_v33 = vsel %vm547_vm8, %v1133_v35, %v546_v58  ;;  %v549_v41 = vsel %vm547_vm8, %v546_v58, %v1133_v35 }
 0x1b5   : > { %v558_v62 = vmul.f32 %v553_v52, %v548_v33  ;;  %v559_v30 = vmul.f32 %v557_v53, %v549_v41  ;;  %v541_v7 = vadd.f32 %v539_v42, %v516_v1  ;;  %v542_v8 = vadd.f32 %v540_v61, %v517_v2 }
 0x1b7   : > { %v564_v3 = vmul.f32 %v562_v56, %v558_v62  ;;  %v565_v35 = vmul.f32 %v562_v56, %v559_v30  ;;  %v571_v4 = vpop.permute.xlu1 %570 }
 0x1b8   : > { %v573_v32 = vsel %vm572_vm9, %v1139_v39, %v571_v4  ;;  %v574_v5 = vsel %vm572_vm9, %v571_v4, %v1139_v39 }
 0x1b9   : > { %v583_v9 = vmul.f32 %v704_v63, %v573_v32  ;;  %v584_v10 = vmul.f32 %v705_v0, %v574_v5  ;;  %v566_v11 = vadd.f32 %v564_v3, %v541_v7  ;;  %v567_v12 = vadd.f32 %v565_v35, %v542_v8 }
 0x1bb   : > { %v589_v13 = vmul.f32 %v587_v6, %v583_v9  ;;  %v590_v14 = vmul.f32 %v587_v6, %v584_v10 }
 0x1bd   : > { %v591_v15 = vadd.f32 %v589_v13, %v566_v11  ;;  %v592_v16 = vadd.f32 %v590_v14, %v567_v12 }
 0x1bf   : > { %593 = vst [vmem:[%s280_s30] sm:$0xff] %v591_v15  ;;  %594 = vst [vmem:[%s280_s30 + $0x8] sm:$0xff] %v592_v16 }
 0x1c0   : > { %866 = shalt.err (!%p863_p3)
}
 0x1c1   : > { %s867_s7 = scalar_lea.hbm %s1225_s15, 256  ;;  %s871_s11 = scalar_lea.hbm %s1268_s6, 512 }
 0x1c2   : > { %p868_p12 = scmp.ne.s32.totalorder %s1225_s15, %s867_s7  ;;  %p872_p6 = scmp.lt.s32.totalorder %s1225_s15, %s1268_s6 }
 0x1c3   : > { %p873_p4 = scmp.lt.s32.totalorder %s871_s11, %s867_s7 }
 0x1c4   : > { %p869_p5 = pnand %p868_p12, %p1287_p11 }
 0x1c5   : > { %p874_p8 = por %p873_p4, %p872_p6 }
 0x1c6   : > { %p870_p7 = pneg %p869_p5 }
 0x1c8   : > { %p875_p9 = pnand %p874_p8, %p870_p7 }
 0x1ca   : > { %878 = shalt.err (!%p875_p9)
}
 0x1cb   : > { %719 = dma.vmem_to_hbm [thread:$0]  (%p1287_p11), %s611_s18, 256, %s1225_s15, %s596_s20  }
 0x1cc PF: > { %s622_s19 = sand.u32 1, %s909_s21   ;;  %p1288_p13 = scmp.ne.s32.totalorder %s1275_s28, 0 }
 0x1cd   : > { %p1289_p10 = scmp.ge.s32.totalorder %s921_s24, 2  ;;  %s623_s30 = scalar_lea.sflag [#allocation4], %s622_s19 }
 0x1cf   : > { %p730_p1 = pnand %p1289_p10, %p1288_p13 }
 0x1d1   : > { %p731_p2 = pneg %p730_p1 }
 0x1d3   : > { %904 = dma.done.wait (%p731_p2), %s623_s30, 256  }
 0x1d4   : > { %906 = vsyncadd (%p731_p2), %s623_s30, 4294967040  ;;  %p20_p0 = scmp.ge.s32.totalorder %s1027_s8, 4   ;;  %s1290_s21 = smov %s913_s22 }
 0x1d5   : > { %s1291_s22 = smov %s917_s23  ;;  %s1292_s23 = smov %s1054_s16 }
 0x1d6   : > { %s1293_s24 = smov %s1027_s8  ;;  %22 = sbr.rel (!%p20_p0) target bundleno = 8 (0x8), region = 93 }
 0x1db   :  { %628 = vsyncpa [#allocation3], 1 }
 0x1dc   :  { %630 = vsyncpa [#allocation3 + $0x1], 1 }
 0x1dd   :  { %631 = vsyncpa [#allocation6], 1 }
 0x1de   :  { %632 = vsyncpa [#allocation4], 1 }
 0x1df   :  { %634 = vsyncpa [#allocation4 + $0x1], 1 }

</bundles_post_ra>
